<compile_context>
chip_gen: v7x
topology: tpu7x:2x2x1
jax: 0.10.0
libtpu: 0.0.40
codegen_flags: <defaults>
</compile_context>

<pallas_src>
import functools

import jax
import jax.numpy as jnp
from jax.experimental import pallas as pl
from jax.experimental.pallas import tpu as pltpu

HIDDEN = 768        # roberta-base hidden size
MID = 10            # linear1 output size
NUM_CLASSES = 4
BATCH = 2
SEQ = 8             # wav2vec frame count (mean-reduced axis)


def _classifier_kernel(bert_ref, wav_ref, w1_ref, b1_ref, w2_ref, b2_ref,
                       out_ref, *, inv_t):
    # Mean over T BEFORE the matmul (mean and matmul commute): one XLU sublane
    # sum in f32 plus a single scale, instead of per-frame MXU work.
    wav_mean = jnp.sum(wav_ref[...], axis=1) * inv_t                 # (B, H) f32

    # Fold the concat into a single MXU call: [bert | wav_mean] -> (B, 2H)
    # bf16 against the full compact (2H, MID) weight.  Casts run on the VPU
    # right before the dot; accumulation stays f32.
    x = jnp.concatenate([bert_ref[...], wav_mean], axis=1)           # (B, 2H) f32
    h = jnp.dot(x.astype(jnp.bfloat16), w1_ref[...].astype(jnp.bfloat16),
                preferred_element_type=jnp.float32) + b1_ref[...]    # (B, MID) f32
    h = jnp.maximum(h, 0.0)                                          # f32 ReLU (v5e-safe)

    # linear2: bf16 operands (native MXU rate on all generations), f32 acc + bias.
    out_ref[...] = (jnp.dot(h.astype(jnp.bfloat16),
                            w2_ref[...].astype(jnp.bfloat16),
                            preferred_element_type=jnp.float32)
                    + b2_ref[...])                                   # (B, C) f32


def roberta_wav2vec_classifier(bert_pooled, wav_feats, w1, b1, w2, b2):
    """Forward pass of the classifier head.

    Args:
      bert_pooled: (B, H) float32    -- RoBERTa pooler_output
      wav_feats:   (B, T, H) float32 -- Wav2Vec features (mean over T inside)
      w1: (2H, MID) float32  (stored as (in, out), i.e. nn.Linear weight.T)
      b1: (MID,)    float32
      w2: (MID, C)  float32  (stored as (in, out))
      b2: (C,)      float32
    Returns:
      (B, C) float32 logits.
    """
    B, H = bert_pooled.shape
    T = wav_feats.shape[1]
    mid = w1.shape[1]
    C = w2.shape[1]

    # Raw compact f32 weights / activations go straight into the kernel: no
    # per-call padded-weight rebuilds and no standalone cast launches.  Biases
    # are only reshaped to 2-D (metadata-level op).
    b1_2d = b1.reshape(1, mid)
    b2_2d = b2.reshape(1, C)

    flops = (B * T * H                      # wav sublane sum
             + 2 * B * (2 * H) * mid        # fused linear1
             + 2 * B * mid * C)             # linear2
    bytes_accessed = (bert_pooled.size * 4 + wav_feats.size * 4
                      + w1.size * 4 + b1.size * 4 + w2.size * 4 + b2.size * 4
                      + B * C * 4)

    vmem_spec = pl.BlockSpec(memory_space=pltpu.MemorySpace.VMEM)

    # TODO(synk): at realistic Wav2Vec sizes (T~500, B>=32) switch to a grid:
    # an "arbitrary" T axis accumulating the f32 (B, H) mean into a VMEM
    # scratch (pl.when init/finalize), a "parallel" batch axis so both v7x
    # TensorCores engage, and explicit pltpu.CompilerParams(vmem_limit_bytes=...)
    # (whole-array wav residency overflows v7x's 64 MiB VMEM at those sizes).
    # At B=2 / T=8 everything fits in VMEM and a grid-less call is cheapest.
    out = pl.pallas_call(
        functools.partial(_classifier_kernel, inv_t=1.0 / T),
        out_shape=jax.ShapeDtypeStruct((B, C), jnp.float32),
        in_specs=[vmem_spec] * 6,
        out_specs=vmem_spec,
        cost_estimate=pl.CostEstimate(
            flops=flops, transcendentals=0, bytes_accessed=bytes_accessed),
    )(bert_pooled, wav_feats, w1, b1_2d, w2, b2_2d)
    return out


def _reference(bert_pooled, wav_feats, w1, b1, w2, b2):
    wav_mean = jnp.mean(wav_feats, axis=-2)
    x = jnp.concatenate([bert_pooled, wav_mean], axis=1)
    h = jnp.maximum(x @ w1 + b1, 0.0)
    return h @ w2 + b2


if __name__ == "__main__":
    key = jax.random.PRNGKey(0)
    k_bert, k_wav, k_w1, k_b1, k_w2, k_b2 = jax.random.split(key, 6)

    # Synthetic backbone outputs.
    bert_pooled = jax.random.normal(k_bert, (BATCH, HIDDEN), dtype=jnp.float32)
    wav_feats = jax.random.normal(k_wav, (BATCH, SEQ, HIDDEN), dtype=jnp.float32)

    # Deterministic classifier-head parameters (shapes per nn.Linear in __init__).
    w1 = jax.random.normal(k_w1, (2 * HIDDEN, MID), dtype=jnp.float32) * 0.02
    b1 = jax.random.normal(k_b1, (MID,), dtype=jnp.float32) * 0.02
    w2 = jax.random.normal(k_w2, (MID, NUM_CLASSES), dtype=jnp.float32) * 0.02
    b2 = jax.random.normal(k_b2, (NUM_CLASSES,), dtype=jnp.float32) * 0.02

    out = roberta_wav2vec_classifier(bert_pooled, wav_feats, w1, b1, w2, b2)
    out = jax.block_until_ready(out)

    ref = _reference(bert_pooled, wav_feats, w1, b1, w2, b2)
    assert out.shape == (BATCH, NUM_CLASSES), out.shape
    # bf16 matmul operands (f32 accumulation) vs full-f32 reference: tolerance
    # sized for bf16 input rounding over the K=1536 contraction.
    assert jnp.allclose(out, ref, atol=5e-3, rtol=5e-3), (out, ref)

    print("KERNEL_OK")
</pallas_src>

<mosaic_0001>
module attributes {stable_mosaic.version = 11 : i64} {
  func.func @_classifier_kernel(%arg0: memref<2x768xf32, #tpu.memory_space<vmem>>, %arg1: memref<2x8x768xf32, #tpu.memory_space<vmem>>, %arg2: memref<1536x10xf32, #tpu.memory_space<vmem>>, %arg3: memref<1x10xf32, #tpu.memory_space<vmem>>, %arg4: memref<10x4xf32, #tpu.memory_space<vmem>>, %arg5: memref<1x4xf32, #tpu.memory_space<vmem>>, %arg6: memref<2x4xf32, #tpu.memory_space<vmem>>) attributes {dimension_semantics = [], scalar_prefetch = 0 : i64, scratch_operands = 0 : i64, tpu.core_type = #tpu.core_type<tc>} {
    %c0 = arith.constant 0 : index
    %c0_0 = arith.constant 0 : index
    %c0_1 = arith.constant 0 : index
    %0 = vector.load %arg1[%c0, %c0_0, %c0_1] : memref<2x8x768xf32, #tpu.memory_space<vmem>>, vector<2x8x768xf32>
    %cst = arith.constant dense<0.000000e+00> : vector<2x768xf32>
    %1 = vector.multi_reduction <add>, %0, %cst [1] : vector<2x8x768xf32> to vector<2x768xf32>
    %cst_2 = arith.constant 1.250000e-01 : f32
    %2 = vector.broadcast %cst_2 : f32 to vector<2x768xf32>
    %3 = arith.mulf %1, %2 : vector<2x768xf32>
    %c0_3 = arith.constant 0 : index
    %c0_4 = arith.constant 0 : index
    %4 = vector.load %arg0[%c0_3, %c0_4] : memref<2x768xf32, #tpu.memory_space<vmem>>, vector<2x768xf32>
    %5 = tpu.concatenate %4, %3 in 1 : vector<2x768xf32>, vector<2x768xf32> -> vector<2x1536xf32>
    %6 = arith.truncf %5 : vector<2x1536xf32> to vector<2x1536xbf16>
    %c0_5 = arith.constant 0 : index
    %c0_6 = arith.constant 0 : index
    %7 = vector.load %arg2[%c0_5, %c0_6] : memref<1536x10xf32, #tpu.memory_space<vmem>>, vector<1536x10xf32>
    %8 = arith.truncf %7 : vector<1536x10xf32> to vector<1536x10xbf16>
    %cst_7 = arith.constant dense<0.000000e+00> : vector<2x10xf32>
    %9 = tpu.matmul %6, %8, %cst_7 {dimension_numbers = #tpu.dot_dimension_numbers<[1], [0], [0], [1], [0, 0, 1, 1], [], []>} : vector<2x1536xbf16>, vector<1536x10xbf16>, vector<2x10xf32> -> vector<2x10xf32>
    %c0_8 = arith.constant 0 : index
    %c0_9 = arith.constant 0 : index
    %10 = vector.load %arg3[%c0_8, %c0_9] : memref<1x10xf32, #tpu.memory_space<vmem>>, vector<1x10xf32>
    %11 = vector.broadcast %10 : vector<1x10xf32> to vector<2x10xf32>
    %12 = arith.addf %9, %11 : vector<2x10xf32>
    %cst_10 = arith.constant 0.000000e+00 : f32
    %13 = vector.broadcast %cst_10 : f32 to vector<2x10xf32>
    %14 = arith.maximumf %12, %13 : vector<2x10xf32>
    %15 = arith.truncf %14 : vector<2x10xf32> to vector<2x10xbf16>
    %c0_11 = arith.constant 0 : index
    %c0_12 = arith.constant 0 : index
    %16 = vector.load %arg4[%c0_11, %c0_12] : memref<10x4xf32, #tpu.memory_space<vmem>>, vector<10x4xf32>
    %17 = arith.truncf %16 : vector<10x4xf32> to vector<10x4xbf16>
    %cst_13 = arith.constant dense<0.000000e+00> : vector<2x4xf32>
    %18 = tpu.matmul %15, %17, %cst_13 {dimension_numbers = #tpu.dot_dimension_numbers<[1], [0], [0], [1], [0, 0, 1, 1], [], []>} : vector<2x10xbf16>, vector<10x4xbf16>, vector<2x4xf32> -> vector<2x4xf32>
    %c0_14 = arith.constant 0 : index
    %c0_15 = arith.constant 0 : index
    %19 = vector.load %arg5[%c0_14, %c0_15] : memref<1x4xf32, #tpu.memory_space<vmem>>, vector<1x4xf32>
    %20 = vector.broadcast %19 : vector<1x4xf32> to vector<2x4xf32>
    %21 = arith.addf %18, %20 : vector<2x4xf32>
    %c0_16 = arith.constant 0 : index
    %c0_17 = arith.constant 0 : index
    %22 = vector.load %arg6[%c0_16, %c0_17] : memref<2x4xf32, #tpu.memory_space<vmem>>, vector<2x4xf32>
    tpu.vector_store %arg6[%c0_16, %c0_17], %21 {strides = array<i32>} : memref<2x4xf32, #tpu.memory_space<vmem>>, vector<2x4xf32>,
    return
  }
}

</mosaic_0001>

<bundles_post_ra>
// kernel: tpu_custom_call.1
= control target key start
LH: loop header
LB: loop body
LE: loop exit
PB: predicated region body
PF: predicated region fallthrough
CT: control target
= control target key end

     0   :  { %v977_v47 = vmov 1983009808   ;;  %v129_v49 = vlaneseq  ;;  %vm168_vm0 = vcmask 1041409   ;;  %s1766_s0 = inlined_call_operand.vmem [shape: f32[2,768], index: 0, kind: input, shape index: {}]   ;;  %s1767_s1 = inlined_call_operand.vmem [shape: f32[2,8,768], index: 1, kind: input, shape index: {}]   ;;  %s1768_s2 = inlined_call_operand.vmem [shape: f32[1536,10], index: 2, kind: input, shape index: {}]   ;;  %s1769_s3 = inlined_call_operand.vmem [shape: f32[1,10], index: 3, kind: input, shape index: {}]   ;;  %s1770_s4 = inlined_call_operand.vmem [shape: f32[10,4], index: 4, kind: input, shape index: {}]   ;;  %s1771_s5 = inlined_call_operand.vmem [shape: f32[1,4], index: 5, kind: input, shape index: {}]   ;;  %s1772_s6 = inlined_call_operand.hbm [shape: f32[2,4], index: 6, kind: output, shape index: {}]  }
   0x1   :  { %v209_v0 = vld [vmem:[%s1768_s2 + $0x80] sm:$0xff]  ;;  %v210_v1 = vld [vmem:[%s1768_s2 + $0x88] sm:$0xff]  ;;  %v211_v11 = vld [vmem:[%s1768_s2 + $0x90] sm:$0xff]  ;;  %v127_v48 = vunpack.c.l.s4 %v977_v47 }
   0x2   :  { %v241_v2 = vld [vmem:[%s1768_s2 + $0x180] sm:$0xff]  ;;  %v393_v3 = vpack.c.bf16 %v210_v1, %v209_v0  ;;  %v242_v4 = vld [vmem:[%s1768_s2 + $0x188] sm:$0xff]  ;;  %v212_v13 = vld [vmem:[%s1768_s2 + $0x98] sm:$0xff]  ;;  %v130_v0 = vshrl.u32 %v129_v49, 7 }
   0x3   :  { %v193_v5 = vld [vmem:[%s1768_s2] sm:$0xff]  ;;  %v194_v6 = vld [vmem:[%s1768_s2 + $0x8] sm:$0xff]  ;;  %v409_v7 = vpack.c.bf16 %v242_v4, %v241_v2  ;;  %v243_v14 = vld [vmem:[%s1768_s2 + $0x190] sm:$0xff]  ;;  %v394_v16 = vpack.c.bf16 %v212_v13, %v211_v11  ;;  %v128_v63 = vunpack.c.0.s8 %v127_v48 }
   0x4   :  { %v385_v8 = vpack.c.bf16 %v194_v6, %v193_v5  ;;  %v225_v9 = vld [vmem:[%s1768_s2 + $0x100] sm:$0xff]  ;;  %v226_v10 = vld [vmem:[%s1768_s2 + $0x108] sm:$0xff]  ;;  %808 = vmatprep.subr.bf16.mxu0 %v393_v3  ;;  %v244_v15 = vld [vmem:[%s1768_s2 + $0x198] sm:$0xff] }
   0x5   :  { %v401_v12 = vpack.c.bf16 %v226_v10, %v225_v9  ;;  %830 = vmatprep.subr.bf16.mxu1 %v409_v7  ;;  %v410_v17 = vpack.c.bf16 %v244_v15, %v243_v14  ;;  %v195_v18 = vld [vmem:[%s1768_s2 + $0x10] sm:$0xff]  ;;  %v196_v19 = vld [vmem:[%s1768_s2 + $0x18] sm:$0xff]  ;;  %v213_v23 = vld [vmem:[%s1768_s2 + $0xa0] sm:$0xff]  ;;  %v131_v13 = vsub.s32 %v128_v63, %v130_v0 }
   0x6   :  { %809 = vmatpush3.bf16.msra.mxu0 %v385_v8  ;;  %v227_v20 = vld [vmem:[%s1768_s2 + $0x110] sm:$0xff]  ;;  %v386_v21 = vpack.c.bf16 %v196_v19, %v195_v18  ;;  %v228_v22 = vld [vmem:[%s1768_s2 + $0x118] sm:$0xff]  ;;  %v214_v24 = vld [vmem:[%s1768_s2 + $0xa8] sm:$0xff] }
   0x7   :  { %831 = vmatpush3.bf16.msra.mxu1 %v401_v12  ;;  %810 = vmatprep.subr.bf16.mxu0 %v394_v16  ;;  %v402_v25 = vpack.c.bf16 %v228_v22, %v227_v20  ;;  %v395_v26 = vpack.c.bf16 %v214_v24, %v213_v23  ;;  %v245_v27 = vld [vmem:[%s1768_s2 + $0x1a0] sm:$0xff]  ;;  %v246_v28 = vld [vmem:[%s1768_s2 + $0x1a8] sm:$0xff]  ;;  %v215_v35 = vld [vmem:[%s1768_s2 + $0xb0] sm:$0xff] }
   0x8   :  { %832 = vmatprep.subr.bf16.mxu1 %v410_v17  ;;  %v197_v29 = vld [vmem:[%s1768_s2 + $0x20] sm:$0xff]  ;;  %v411_v30 = vpack.c.bf16 %v246_v28, %v245_v27  ;;  %v198_v31 = vld [vmem:[%s1768_s2 + $0x28] sm:$0xff]  ;;  %v216_v36 = vld [vmem:[%s1768_s2 + $0xb8] sm:$0xff] }
   0x9   :  { %v229_v32 = vld [vmem:[%s1768_s2 + $0x120] sm:$0xff]  ;;  %v230_v33 = vld [vmem:[%s1768_s2 + $0x128] sm:$0xff]  ;;  %v387_v34 = vpack.c.bf16 %v198_v31, %v197_v29  ;;  %v247_v37 = vld [vmem:[%s1768_s2 + $0x1b0] sm:$0xff]  ;;  %v396_v39 = vpack.c.bf16 %v216_v36, %v215_v35 }
   0xa   :  { %811 = vmatpush3.bf16.msra.mxu0 %v386_v21  ;;  %v403_v38 = vpack.c.bf16 %v230_v33, %v229_v32  ;;  %v248_v40 = vld [vmem:[%s1768_s2 + $0x1b8] sm:$0xff]  ;;  %v199_v41 = vld [vmem:[%s1768_s2 + $0x30] sm:$0xff]  ;;  %v217_v46 = vld [vmem:[%s1768_s2 + $0xc0] sm:$0xff] }
   0xb   :  { %833 = vmatpush3.bf16.msra.mxu1 %v402_v25  ;;  %812 = vmatprep.subr.bf16.mxu0 %v395_v26  ;;  %v200_v42 = vld [vmem:[%s1768_s2 + $0x38] sm:$0xff]  ;;  %v412_v43 = vpack.c.bf16 %v248_v40, %v247_v37  ;;  %v231_v44 = vld [vmem:[%s1768_s2 + $0x130] sm:$0xff]  ;;  %v218_v50 = vld [vmem:[%s1768_s2 + $0xc8] sm:$0xff] }
   0xc   :  { %834 = vmatprep.subr.bf16.mxu1 %v411_v30  ;;  %v232_v45 = vld [vmem:[%s1768_s2 + $0x138] sm:$0xff]  ;;  %v249_v51 = vld [vmem:[%s1768_s2 + $0x1c0] sm:$0xff]  ;;  %v250_v52 = vld [vmem:[%s1768_s2 + $0x1c8] sm:$0xff]  ;;  %v388_v53 = vpack.c.bf16 %v200_v42, %v199_v41  ;;  %v397_v55 = vpack.c.bf16 %v218_v50, %v217_v46 }
   0xd   :  { %v404_v54 = vpack.c.bf16 %v232_v45, %v231_v44  ;;  %v201_v56 = vld [vmem:[%s1768_s2 + $0x40] sm:$0xff]  ;;  %v202_v57 = vld [vmem:[%s1768_s2 + $0x48] sm:$0xff]  ;;  %v413_v59 = vpack.c.bf16 %v250_v52, %v249_v51  ;;  %v219_v61 = vld [vmem:[%s1768_s2 + $0xd0] sm:$0xff] }
   0xe   :  { %813 = vmatpush3.bf16.msra.mxu0 %v387_v34  ;;  %v233_v58 = vld [vmem:[%s1768_s2 + $0x140] sm:$0xff]  ;;  %v234_v60 = vld [vmem:[%s1768_s2 + $0x148] sm:$0xff]  ;;  %v220_v62 = vld [vmem:[%s1768_s2 + $0xd8] sm:$0xff]  ;;  %v389_v3 = vpack.c.bf16 %v202_v57, %v201_v56 }
   0xf   :  { %835 = vmatpush3.bf16.msra.mxu1 %v403_v38  ;;  %814 = vmatprep.subr.bf16.mxu0 %v396_v39  ;;  %v251_v1 = vld [vmem:[%s1768_s2 + $0x1d0] sm:$0xff]  ;;  %v252_v2 = vld [vmem:[%s1768_s2 + $0x1d8] sm:$0xff]  ;;  %v405_v4 = vpack.c.bf16 %v234_v60, %v233_v58  ;;  %v398_v5 = vpack.c.bf16 %v220_v62, %v219_v61  ;;  %v221_v11 = vld [vmem:[%s1768_s2 + $0xe0] sm:$0xff] }
  0x10   :  { %836 = vmatprep.subr.bf16.mxu1 %v412_v43  ;;  %v203_v6 = vld [vmem:[%s1768_s2 + $0x50] sm:$0xff]  ;;  %v204_v7 = vld [vmem:[%s1768_s2 + $0x58] sm:$0xff]  ;;  %v414_v9 = vpack.c.bf16 %v252_v2, %v251_v1  ;;  %v222_v12 = vld [vmem:[%s1768_s2 + $0xe8] sm:$0xff] }
  0x11   :  { %v235_v8 = vld [vmem:[%s1768_s2 + $0x150] sm:$0xff]  ;;  %v236_v10 = vld [vmem:[%s1768_s2 + $0x158] sm:$0xff]  ;;  %v253_v14 = vld [vmem:[%s1768_s2 + $0x1e0] sm:$0xff]  ;;  %v390_v16 = vpack.c.bf16 %v204_v7, %v203_v6  ;;  %v399_v19 = vpack.c.bf16 %v222_v12, %v221_v11 }
  0x12   :  { %815 = vmatpush3.bf16.msra.mxu0 %v388_v53  ;;  %v254_v15 = vld [vmem:[%s1768_s2 + $0x1e8] sm:$0xff]  ;;  %v205_v17 = vld [vmem:[%s1768_s2 + $0x60] sm:$0xff]  ;;  %v406_v18 = vpack.c.bf16 %v236_v10, %v235_v8  ;;  %v223_v25 = vld [vmem:[%s1768_s2 + $0xf0] sm:$0xff] }
  0x13   :  { %837 = vmatpush3.bf16.msra.mxu1 %v404_v54  ;;  %816 = vmatprep.subr.bf16.mxu0 %v397_v55  ;;  %v206_v20 = vld [vmem:[%s1768_s2 + $0x68] sm:$0xff]  ;;  %v237_v21 = vld [vmem:[%s1768_s2 + $0x160] sm:$0xff]  ;;  %v415_v23 = vpack.c.bf16 %v254_v15, %v253_v14  ;;  %v224_v26 = vld [vmem:[%s1768_s2 + $0xf8] sm:$0xff] }
  0x14   :  { %838 = vmatprep.subr.bf16.mxu1 %v413_v59  ;;  %v121_v22 = vld [vmem:[%s1766_s0] sm:$0xff]  ;;  %v238_v24 = vld [vmem:[%s1768_s2 + $0x168] sm:$0xff]  ;;  %v255_v29 = vld [vmem:[%s1768_s2 + $0x1f0] sm:$0xff]  ;;  %v391_v31 = vpack.c.bf16 %v206_v20, %v205_v17  ;;  %v400_v35 = vpack.c.bf16 %v224_v26, %v223_v25 }
  0x15   :  { %v132_v27 = vrot.slane %v121_v22, %v131_v13  ;;  %v125_v28 = vcombine.high %v121_v22, %v121_v22  ;;  %v256_v30 = vld [vmem:[%s1768_s2 + $0x1f8] sm:$0xff]  ;;  %v407_v34 = vpack.c.bf16 %v238_v24, %v237_v21  ;;  %v207_v36 = vld [vmem:[%s1768_s2 + $0x70] sm:$0xff]  ;;  %v273_v43 = vld [vmem:[%s1768_s2 + $0x280] sm:$0xff] }
  0x16   :  { %817 = vmatpush3.bf16.msra.mxu0 %v389_v3  ;;  %v208_v37 = vld [vmem:[%s1768_s2 + $0x78] sm:$0xff]  ;;  %v239_v38 = vld [vmem:[%s1768_s2 + $0x170] sm:$0xff]  ;;  %v416_v39 = vpack.c.bf16 %v256_v30, %v255_v29  ;;  %v274_v44 = vld [vmem:[%s1768_s2 + $0x288] sm:$0xff] }
  0x17   :  { %839 = vmatpush3.bf16.msra.mxu1 %v405_v4  ;;  %818 = vmatprep.subr.bf16.mxu0 %v398_v5  ;;  %v140_v32 = vcombine.high %v132_v27, %v132_v27  ;;  %v139_v33 = vrot.slane %v125_v28, %v131_v13  ;;  %v240_v40 = vld [vmem:[%s1768_s2 + $0x178] sm:$0xff]  ;;  %v305_v45 = vld [vmem:[%s1768_s2 + $0x380] sm:$0xff]  ;;  %v306_v46 = vld [vmem:[%s1768_s2 + $0x388] sm:$0xff]  ;;  %v392_v47 = vpack.c.bf16 %v208_v37, %v207_v36 }
  0x18   :  { %840 = vmatprep.subr.bf16.mxu1 %v414_v9  ;;  %v408_v49 = vpack.c.bf16 %v240_v40, %v239_v38  ;;  %v425_v50 = vpack.c.bf16 %v274_v44, %v273_v43  ;;  %v257_v51 = vld [vmem:[%s1768_s2 + $0x200] sm:$0xff]  ;;  %v258_v52 = vld [vmem:[%s1768_s2 + $0x208] sm:$0xff]  ;;  %v441_v54 = vpack.c.bf16 %v306_v46, %v305_v45  ;;  %v275_v56 = vld [vmem:[%s1768_s2 + $0x290] sm:$0xff]  ;;  %v181_v58 = vpack.c.bf16 %v132_v27, %v132_v27 }
  0x19   :  { %v182_v41 = vpack.c.bf16 %v140_v32, %v140_v32  ;;  %v141_v42 = vcombine.high %v139_v33, %v139_v33  ;;  %v289_v53 = vld [vmem:[%s1768_s2 + $0x300] sm:$0xff]  ;;  %v290_v55 = vld [vmem:[%s1768_s2 + $0x308] sm:$0xff]  ;;  %v276_v57 = vld [vmem:[%s1768_s2 + $0x298] sm:$0xff]  ;;  %v183_v61 = vpack.c.bf16 %v139_v33, %v139_v33  ;;  %v417_v62 = vpack.c.bf16 %v258_v52, %v257_v51 }
  0x1a   :  { %819 = vmatpush3.bf16.msra.mxu0 %v390_v16  ;;  %v307_v59 = vld [vmem:[%s1768_s2 + $0x390] sm:$0xff]  ;;  %v308_v60 = vld [vmem:[%s1768_s2 + $0x398] sm:$0xff]  ;;  %v433_v63 = vpack.c.bf16 %v290_v55, %v289_v53  ;;  %v426_v0 = vpack.c.bf16 %v276_v57, %v275_v56  ;;  %v277_v6 = vld [vmem:[%s1768_s2 + $0x2a0] sm:$0xff] }
  0x1b   :  { %841 = vmatpush3.bf16.msra.mxu1 %v406_v18  ;;  %820 = vmatprep.subr.bf16.mxu0 %v399_v19  ;;  %v184_v48 = vpack.c.bf16 %v141_v42, %v141_v42  ;;  %v259_v1 = vld [vmem:[%s1768_s2 + $0x210] sm:$0xff]  ;;  %v260_v2 = vld [vmem:[%s1768_s2 + $0x218] sm:$0xff]  ;;  %v442_v4 = vpack.c.bf16 %v308_v60, %v307_v59  ;;  %v278_v7 = vld [vmem:[%s1768_s2 + $0x2a8] sm:$0xff] }
  0x1c   :  { %842 = vmatprep.subr.bf16.mxu1 %v415_v23  ;;  %520 = vmatprep.mubr.bf16.mxu0 %v182_v41  ;;  %v291_v3 = vld [vmem:[%s1768_s2 + $0x310] sm:$0xff]  ;;  %v292_v5 = vld [vmem:[%s1768_s2 + $0x318] sm:$0xff]  ;;  %v309_v8 = vld [vmem:[%s1768_s2 + $0x3a0] sm:$0xff]  ;;  %v418_v10 = vpack.c.bf16 %v260_v2, %v259_v1  ;;  %v427_v12 = vpack.c.bf16 %v278_v7, %v277_v6 }
  0x1d   :  { %560 = vmatprep.mubr.bf16.mxu1 %v184_v48  ;;  %v310_v9 = vld [vmem:[%s1768_s2 + $0x3a8] sm:$0xff]  ;;  %v434_v11 = vpack.c.bf16 %v292_v5, %v291_v3  ;;  %v261_v13 = vld [vmem:[%s1768_s2 + $0x220] sm:$0xff]  ;;  %v279_v18 = vld [vmem:[%s1768_s2 + $0x2b0] sm:$0xff] }
  0x1e   :  { %821 = vmatpush3.bf16.msra.mxu0 %v391_v31  ;;  %v262_v14 = vld [vmem:[%s1768_s2 + $0x228] sm:$0xff]  ;;  %v293_v15 = vld [vmem:[%s1768_s2 + $0x320] sm:$0xff]  ;;  %v443_v16 = vpack.c.bf16 %v310_v9, %v309_v8  ;;  %v280_v19 = vld [vmem:[%s1768_s2 + $0x2b8] sm:$0xff] }
  0x1f   :  { %843 = vmatpush3.bf16.msra.mxu1 %v407_v34  ;;  %822 = vmatprep.subr.bf16.mxu0 %v400_v35  ;;  %v294_v17 = vld [vmem:[%s1768_s2 + $0x328] sm:$0xff]  ;;  %v311_v20 = vld [vmem:[%s1768_s2 + $0x3b0] sm:$0xff]  ;;  %v312_v21 = vld [vmem:[%s1768_s2 + $0x3b8] sm:$0xff]  ;;  %v419_v22 = vpack.c.bf16 %v262_v14, %v261_v13  ;;  %v428_v26 = vpack.c.bf16 %v280_v19, %v279_v18 }
  0x20   :  { %844 = vmatprep.subr.bf16.mxu1 %v416_v39  ;;  %v263_v23 = vld [vmem:[%s1768_s2 + $0x230] sm:$0xff]  ;;  %v264_v24 = vld [vmem:[%s1768_s2 + $0x238] sm:$0xff]  ;;  %v435_v25 = vpack.c.bf16 %v294_v17, %v293_v15  ;;  %v281_v29 = vld [vmem:[%s1768_s2 + $0x2c0] sm:$0xff]  ;;  %v444_v30 = vpack.c.bf16 %v312_v21, %v311_v20 }
  0x21   :  { %v295_v27 = vld [vmem:[%s1768_s2 + $0x330] sm:$0xff]  ;;  %v296_v28 = vld [vmem:[%s1768_s2 + $0x338] sm:$0xff]  ;;  %v282_v31 = vld [vmem:[%s1768_s2 + $0x2c8] sm:$0xff]  ;;  %v420_v37 = vpack.c.bf16 %v264_v24, %v263_v23 }
  0x22   :  { %823 = vmatpush3.bf16.msra.mxu0 %v392_v47  ;;  %v313_v32 = vld [vmem:[%s1768_s2 + $0x3c0] sm:$0xff]  ;;  %v314_v33 = vld [vmem:[%s1768_s2 + $0x3c8] sm:$0xff]  ;;  %v32_v36 = vld [vmem:[%s1767_s1 + $0x38] sm:$0xff]  ;;  %v436_v43 = vpack.c.bf16 %v296_v28, %v295_v27  ;;  %v429_v44 = vpack.c.bf16 %v282_v31, %v281_v29 }
  0x23   :  { %845 = vmatpush3.bf16.msra.mxu1 %v408_v49  ;;  %852 = vmatprep.subr.bf16.mxu0 %v425_v50  ;;  %v1322_v34 = vld.sshfl [vmem:[%s1766_s0 + $0x8] sm:$0x33 pattern:$0x76325410]  ;;  %v79_v40 = vrot.slane %v32_v36, 4  ;;  %v25_v41 = vld [vmem:[%s1767_s1] sm:$0xff]  ;;  %v445_v50 = vpack.c.bf16 %v314_v33, %v313_v32 }
  0x24   :  { %874 = vmatprep.subr.bf16.mxu1 %v441_v54  ;;  %v26_v35 = vld [vmem:[%s1767_s1 + $0x8] sm:$0xff]  ;;  %v149_v38 = vcombine.high %v1322_v34, %v1322_v34  ;;  %v31_v42 = vld [vmem:[%s1767_s1 + $0x30] sm:$0xff]  ;;  %v265_v45 = vld [vmem:[%s1768_s2 + $0x240] sm:$0xff]  ;;  %v37_v48 = vrot.slane %v25_v41, 4 }
  0x25   :  { %521 = vmatmul.mubr.bf16.vlgmr.msra.gmra.mrb[0].mxu0 %v181_v58  ;;  %v43_v39 = vrot.slane %v26_v35, 4  ;;  %v266_v46 = vld [vmem:[%s1768_s2 + $0x248] sm:$0xff]  ;;  %v297_v47 = vld [vmem:[%s1768_s2 + $0x340] sm:$0xff]  ;;  %v73_v49 = vrot.slane %v31_v42, 4  ;;  %v283_v52 = vld [vmem:[%s1768_s2 + $0x2d0] sm:$0xff]  ;;  %v80_v56 = vadd.f32 %v79_v40, %v32_v36 }
  0x26   :  { %561 = vmatmul.mubr.bf16.vlgmr.msra.gmra.mrb[0].mxu1 %v183_v61  ;;  %853 = vmatpush3.bf16.msra.mxu0 %v417_v62  ;;  %v298_v51 = vld [vmem:[%s1768_s2 + $0x348] sm:$0xff]  ;;  %v284_v53 = vld [vmem:[%s1768_s2 + $0x2d8] sm:$0xff]  ;;  %v186_v54 = vpack.c.bf16 %v149_v38, %v149_v38  ;;  %v315_v57 = vld [vmem:[%s1768_s2 + $0x3d0] sm:$0xff]  ;;  %v38_v59 = vadd.f32 %v37_v48, %v25_v41  ;;  %v421_v61 = vpack.c.bf16 %v266_v46, %v265_v45 }
  0x27   :  { %875 = vmatpush3.bf16.msra.mxu1 %v433_v63  ;;  %854 = vmatprep.subr.bf16.mxu0 %v426_v0  ;;  %v44_v55 = vadd.f32 %v43_v39, %v26_v35  ;;  %v316_v58 = vld [vmem:[%s1768_s2 + $0x3d8] sm:$0xff]  ;;  %v74_v60 = vadd.f32 %v73_v49, %v31_v42  ;;  %v81_v63 = vrot.slane %v80_v56, 2  ;;  %v437_v0 = vpack.c.bf16 %v298_v51, %v297_v47  ;;  %v267_v2 = vld [vmem:[%s1768_s2 + $0x250] sm:$0xff]  ;;  %v285_v9 = vld [vmem:[%s1768_s2 + $0x2e0] sm:$0xff] }
  0x28   :  { %876 = vmatprep.subr.bf16.mxu1 %v442_v4  ;;  %600 = vmatprep.mubr.bf16.mxu0 %v186_v54  ;;  %v430_v1 = vpack.c.bf16 %v284_v53, %v283_v52  ;;  %v268_v3 = vld [vmem:[%s1768_s2 + $0x258] sm:$0xff]  ;;  %v299_v4 = vld [vmem:[%s1768_s2 + $0x350] sm:$0xff]  ;;  %v39_v5 = vrot.slane %v38_v59, 2  ;;  %v446_v7 = vpack.c.bf16 %v316_v58, %v315_v57  ;;  %v317_v13 = vld [vmem:[%s1768_s2 + $0x3e0] sm:$0xff] }
  0x29   :  { %v45_v62 = vrot.slane %v44_v55, 2  ;;  %v75_v6 = vrot.slane %v74_v60, 2  ;;  %v300_v8 = vld [vmem:[%s1768_s2 + $0x358] sm:$0xff]  ;;  %v318_v14 = vld [vmem:[%s1768_s2 + $0x3e8] sm:$0xff]  ;;  %v422_v17 = vpack.c.bf16 %v268_v3, %v267_v2  ;;  %v301_v24 = vld [vmem:[%s1768_s2 + $0x360] sm:$0xff] }
  0x2a   :  { %855 = vmatpush3.bf16.msra.mxu0 %v418_v10  ;;  %v286_v10 = vld [vmem:[%s1768_s2 + $0x2e8] sm:$0xff]  ;;  %v40_v15 = vadd.f32 %v39_v5, %v38_v59  ;;  %v438_v20 = vpack.c.bf16 %v300_v8, %v299_v4  ;;  %v447_v27 = vpack.c.bf16 %v318_v14, %v317_v13  ;;  %v287_v29 = vld [vmem:[%s1768_s2 + $0x2f0] sm:$0xff]  ;;  %v320_v35 = vld [vmem:[%s1768_s2 + $0x3f8] sm:$0xff] }
  0x2b   :  { %877 = vmatpush3.bf16.msra.mxu1 %v434_v11  ;;  %856 = vmatprep.subr.bf16.mxu0 %v427_v12  ;;  %v46_v11 = vadd.f32 %v45_v62, %v44_v55  ;;  %v82_v12 = vadd.f32 %v81_v63, %v80_v56  ;;  %v431_v21 = vpack.c.bf16 %v286_v10, %v285_v9  ;;  %v270_v23 = vld [vmem:[%s1768_s2 + $0x268] sm:$0xff]  ;;  %v319_v33 = vld [vmem:[%s1768_s2 + $0x3f0] sm:$0xff]  ;;  %v272_v40 = vld [vmem:[%s1768_s2 + $0x278] sm:$0xff] }
  0x2c   :  { %878 = vmatprep.subr.bf16.mxu1 %v443_v16  ;;  %v76_v16 = vadd.f32 %v75_v6, %v74_v60  ;;  %v302_v28 = vld [vmem:[%s1768_s2 + $0x368] sm:$0xff]  ;;  %v271_v36 = vld [vmem:[%s1768_s2 + $0x270] sm:$0xff]  ;;  %v304_v42 = vld [vmem:[%s1768_s2 + $0x378] sm:$0xff]  ;;  %v448_v52 = vpack.c.bf16 %v320_v35, %v319_v33 }
  0x2d   :  { %v47_v18 = vrot.slane %v46_v11, 1  ;;  %v83_v19 = vrot.slane %v82_v12, 1  ;;  %v303_v41 = vld [vmem:[%s1768_s2 + $0x370] sm:$0xff]  ;;  %v439_v45 = vpack.c.bf16 %v302_v28, %v301_v24  ;;  %v337_v49 = vld [vmem:[%s1768_s2 + $0x480] sm:$0xff]  ;;  %v370_v54 = vld [vmem:[%s1768_s2 + $0x588] sm:$0xff] }
  0x2e   :  { %857 = vmatpush3.bf16.msra.mxu0 %v419_v22  ;;  %v269_v22 = vld [vmem:[%s1768_s2 + $0x260] sm:$0xff]  ;;  %v1443_v56 = vld [vmem:[%s1768_s2 + $0x408] sm:$0xff]  ;;  %v1458_v60 = vld [vmem:[%s1768_s2 + $0x490] sm:$0xff]  ;;  %v440_v6 = vpack.c.bf16 %v304_v42, %v303_v41 }
  0x2f   :  { %879 = vmatpush3.bf16.msra.mxu1 %v435_v25  ;;  %858 = vmatprep.subr.bf16.mxu0 %v428_v26  ;;  %v41_v25 = vrot.slane %v40_v15, 1  ;;  %v77_v26 = vrot.slane %v76_v16, 1  ;;  %v48_v31 = vadd.f32 %v47_v18, %v46_v11  ;;  %v84_v32 = vadd.f32 %v83_v19, %v82_v12  ;;  %v369_v51 = vld [vmem:[%s1768_s2 + $0x580] sm:$0xff]  ;;  %v1453_v59 = vld [vmem:[%s1768_s2 + $0x508] sm:$0xff]  ;;  %v1468_v62 = vld [vmem:[%s1768_s2 + $0x590] sm:$0xff] }
  0x30   :  { %880 = vmatprep.subr.bf16.mxu1 %v444_v30  ;;  %v288_v30 = vld [vmem:[%s1768_s2 + $0x2f8] sm:$0xff]  ;;  %v423_v39 = vpack.c.bf16 %v270_v23, %v269_v22  ;;  %v1438_v55 = vld [vmem:[%s1768_s2 + $0x400] sm:$0xff]  ;;  %v1488_v3 = vld [vmem:[%s1768_s2 + $0x510] sm:$0xff]  ;;  %v473_v12 = vpack.c.bf16 %v370_v54, %v369_v51 }
  0x31   :  { %v78_v38 = vadd.f32 %v77_v26, %v76_v16  ;;  %v432_v46 = vpack.c.bf16 %v288_v30, %v287_v29  ;;  %v1448_v58 = vld [vmem:[%s1768_s2 + $0x500] sm:$0xff]  ;;  %v1473_v63 = vld [vmem:[%s1768_s2 + $0x598] sm:$0xff]  ;;  %v1504_v9 = vld [vmem:[%s1768_s2 + $0x4a8] sm:$0xff]  ;;  %v185_v16 = vpack.c.bf16 %v1322_v34, %v1322_v34 }
  0x32   :  { %859 = vmatpush3.bf16.msra.mxu0 %v420_v37  ;;  %v42_v37 = vadd.f32 %v41_v25, %v40_v15  ;;  %v1483_v2 = vld [vmem:[%s1768_s2 + $0x418] sm:$0xff]  ;;  %v1498_v5 = vld [vmem:[%s1768_s2 + $0x4a0] sm:$0xff]  ;;  %v1514_v11 = vld [vmem:[%s1768_s2 + $0x5a8] sm:$0xff]  ;;  %v474_v23 = vpack.c.bf16 %v1473_v63, %v1468_v62 }
  0x33   :  { %881 = vmatpush3.bf16.msra.mxu1 %v436_v43  ;;  %860 = vmatprep.subr.bf16.mxu0 %v429_v44  ;;  %v110_v43 = vmul.f32 0.125, %v48_v31  ;;  %v116_v44 = vmul.f32 0.125, %v84_v32  ;;  %v115_v48 = vmul.f32 0.125, %v78_v38  ;;  %v1493_v4 = vld [vmem:[%s1768_s2 + $0x518] sm:$0xff]  ;;  %v1509_v10 = vld [vmem:[%s1768_s2 + $0x5a0] sm:$0xff]  ;;  %v1524_v14 = vld [vmem:[%s1768_s2 + $0x428] sm:$0xff]  ;;  %v459_v28 = vpack.c.bf16 %v1504_v9, %v1498_v5 }
  0x34   :  { %882 = vmatprep.subr.bf16.mxu1 %v445_v50  ;;  %v109_v47 = vmul.f32 0.125, %v42_v37  ;;  %v338_v50 = vld [vmem:[%s1768_s2 + $0x488] sm:$0xff]  ;;  %v1519_v13 = vld [vmem:[%s1768_s2 + $0x420] sm:$0xff]  ;;  %v1543_v19 = vld [vmem:[%s1768_s2 + $0x4b0] sm:$0xff]  ;;  %v475_v31 = vpack.c.bf16 %v1514_v11, %v1509_v10 }
  0x35   :  { %v170_v53 = vsel %vm168_vm0, %v116_v44, %v110_v43  ;;  %v457_v8 = vpack.c.bf16 %v338_v50, %v337_v49  ;;  %v1529_v15 = vld [vmem:[%s1768_s2 + $0x520] sm:$0xff]  ;;  %v1538_v18 = vld [vmem:[%s1768_s2 + $0x528] sm:$0xff]  ;;  %v1559_v24 = vld [vmem:[%s1768_s2 + $0x5b0] sm:$0xff]  ;;  %v451_v32 = vpack.c.bf16 %v1524_v14, %v1519_v13 }
  0x36   :  { %861 = vmatpush3.bf16.msra.mxu0 %v421_v61  ;;  %v188_v57 = vpack.c.bf16 %v170_v53, %v170_v53  ;;  %v1463_v61 = vld [vmem:[%s1768_s2 + $0x498] sm:$0xff]  ;;  %v1575_v29 = vld [vmem:[%s1768_s2 + $0x430] sm:$0xff]  ;;  %v467_v33 = vpack.c.bf16 %v1538_v18, %v1529_v15  ;;  %v34_v37 = vld [vmem:[%s1767_s1 + $0x48] sm:$0xff] }
  0x37   :  { %883 = vmatpush3.bf16.msra.mxu1 %v437_v0  ;;  %862 = vmatprep.subr.bf16.mxu0 %v430_v1  ;;  %v424_v0 = vpack.c.bf16 %v272_v40, %v271_v36  ;;  %v1478_v1 = vld [vmem:[%s1768_s2 + $0x410] sm:$0xff]  ;;  %v458_v22 = vpack.c.bf16 %v1463_v61, %v1458_v60  ;;  %v1564_v25 = vld [vmem:[%s1768_s2 + $0x5b8] sm:$0xff]  ;;  %v30_v38 = vld [vmem:[%s1767_s1 + $0x28] sm:$0xff]  ;;  %v91_v41 = vrot.slane %v34_v37, 4 }
  0x38   :  { %884 = vmatprep.subr.bf16.mxu1 %v446_v7  ;;  %v169_v7 = vsel %vm168_vm0, %v115_v48, %v109_v47  ;;  %640 = vmatprep.mubr.bf16.mxu1 %v188_v57  ;;  %v450_v26 = vpack.c.bf16 %v1483_v2, %v1478_v1  ;;  %v1580_v30 = vld [vmem:[%s1768_s2 + $0x438] sm:$0xff]  ;;  %v67_v43 = vrot.slane %v30_v38, 4  ;;  %v27_v44 = vld [vmem:[%s1767_s1 + $0x10] sm:$0xff]  ;;  %v29_v50 = vld [vmem:[%s1767_s1 + $0x20] sm:$0xff] }
  0x39   :  { %v187_v34 = vpack.c.bf16 %v169_v7, %v169_v7  ;;  %v28_v36 = vld [vmem:[%s1767_s1 + $0x18] sm:$0xff]  ;;  %v49_v48 = vrot.slane %v27_v44, 4  ;;  %v35_v51 = vld [vmem:[%s1767_s1 + $0x50] sm:$0xff]  ;;  %v92_v53 = vadd.f32 %v91_v41, %v34_v37 }
  0x3a   :  { %863 = vmatpush3.bf16.msra.mxu0 %v422_v17  ;;  %v449_v17 = vpack.c.bf16 %v1443_v56, %v1438_v55  ;;  %v55_v40 = vrot.slane %v28_v36, 4  ;;  %v36_v42 = vld [vmem:[%s1767_s1 + $0x58] sm:$0xff]  ;;  %v68_v54 = vadd.f32 %v67_v43, %v30_v38  ;;  %v61_v55 = vrot.slane %v29_v50, 4 }
  0x3b   :  { %885 = vmatpush3.bf16.msra.mxu1 %v438_v20  ;;  %864 = vmatprep.subr.bf16.mxu0 %v431_v21  ;;  %v1548_v20 = vld [vmem:[%s1768_s2 + $0x4b8] sm:$0xff]  ;;  %v465_v21 = vpack.c.bf16 %v1453_v59, %v1448_v58  ;;  %v103_v47 = vrot.slane %v36_v42, 4 }
  0x3c   :  { %886 = vmatprep.subr.bf16.mxu1 %v447_v27  ;;  %v466_v27 = vpack.c.bf16 %v1493_v4, %v1488_v3  ;;  %v460_v35 = vpack.c.bf16 %v1548_v20, %v1543_v19 }
  0x3e   :  { %865 = vmatpush3.bf16.msra.mxu0 %v423_v39  ;;  %v476_v39 = vpack.c.bf16 %v1564_v25, %v1559_v24 }
  0x3f   :  { %887 = vmatpush3.bf16.msra.mxu1 %v439_v45  ;;  %866 = vmatprep.subr.bf16.mxu0 %v432_v46  ;;  %v33_v45 = vld [vmem:[%s1767_s1 + $0x40] sm:$0xff]  ;;  %v452_v46 = vpack.c.bf16 %v1580_v30, %v1575_v29 }
  0x40   :  { %888 = vmatprep.subr.bf16.mxu1 %v448_v52  ;;  %v85_v49 = vrot.slane %v33_v45, 4  ;;  %v56_v52 = vadd.f32 %v55_v40, %v28_v36 }
  0x42   :  { %867 = vmatpush3.bf16.msra.mxu0 %v424_v0 }
  0x43   :  { %889 = vmatpush3.bf16.msra.mxu1 %v440_v6  ;;  %896 = vmatprep.subr.bf16.mxu0 %v457_v8 }
  0x44   :  { %918 = vmatprep.subr.bf16.mxu1 %v473_v12 }
  0x45   :  { %601 = vmatmul.mubr.bf16.vlgmr.msra.gmra.mrb[4].mxu0 %v185_v16 }
  0x46   :  { %641 = vmatmul.mubr.bf16.vlgmr.msra.gmra.mrb[4].mxu1 %v187_v34  ;;  %897 = vmatpush3.bf16.msra.mxu0 %v449_v17 }
  0x47   :  { %919 = vmatpush3.bf16.msra.mxu1 %v465_v21  ;;  %898 = vmatprep.subr.bf16.mxu0 %v458_v22 }
  0x48   :  { %11 = vsyncpa [#allocation3], 0  ;;  %920 = vmatprep.subr.bf16.mxu1 %v474_v23  ;;  %v1621_v56 = vld [vmem:[%s1768_s2 + $0x530] sm:$0xff]  ;;  %v104_v57 = vadd.f32 %v103_v47, %v36_v42  ;;  %v50_v58 = vadd.f32 %v49_v48, %v27_v44  ;;  %v86_v59 = vadd.f32 %v85_v49, %v33_v45  ;;  %v97_v60 = vrot.slane %v35_v51, 4  ;;  %v360_v61 = vld [vmem:[%s1768_s2 + $0x538] sm:$0xff]  ;;  %s980_s18 = smov [#allocation2]  }
  0x49   :  { %v345_v62 = vld [vmem:[%s1768_s2 + $0x4c0] sm:$0xff]  ;;  %v346_v63 = vld [vmem:[%s1768_s2 + $0x4c8] sm:$0xff]  ;;  %v57_v0 = vrot.slane %v56_v52, 2  ;;  %v93_v1 = vrot.slane %v92_v53, 2  ;;  %v69_v2 = vrot.slane %v68_v54, 2  ;;  %v62_v3 = vadd.f32 %v61_v55, %v29_v50  ;;  %v347_v18 = vld [vmem:[%s1768_s2 + $0x4d0] sm:$0xff] }
  0x4a   :  { %899 = vmatpush3.bf16.msra.mxu0 %v450_v26  ;;  %v105_v4 = vrot.slane %v104_v57, 2  ;;  %v51_v5 = vrot.slane %v50_v58, 2  ;;  %v87_v6 = vrot.slane %v86_v59, 2  ;;  %v98_v7 = vadd.f32 %v97_v60, %v35_v51  ;;  %v377_v21 = vld [vmem:[%s1768_s2 + $0x5c0] sm:$0xff]  ;;  %v378_v22 = vld [vmem:[%s1768_s2 + $0x5c8] sm:$0xff]  ;;  %v348_v19 = vld [vmem:[%s1768_s2 + $0x4d8] sm:$0xff] }
  0x4b   :  { %921 = vmatpush3.bf16.msra.mxu1 %v466_v27  ;;  %900 = vmatprep.subr.bf16.mxu0 %v459_v28  ;;  %v58_v8 = vadd.f32 %v57_v0, %v56_v52  ;;  %v94_v9 = vadd.f32 %v93_v1, %v92_v53  ;;  %v70_v10 = vadd.f32 %v69_v2, %v68_v54  ;;  %v63_v11 = vrot.slane %v62_v3, 2  ;;  %v330_v36 = vld [vmem:[%s1768_s2 + $0x448] sm:$0xff]  ;;  %v361_v13 = vld [vmem:[%s1768_s2 + $0x540] sm:$0xff]  ;;  %v380_v24 = vld [vmem:[%s1768_s2 + $0x5d8] sm:$0xff]  ;;  %s796_s19 = sshll.u32 %s980_s18, 4  ;;  %s797_s19 = int_to_ptr.vmem [resolvable:$true] %s796_s19 }
  0x4c   :  { %922 = vmatprep.subr.bf16.mxu1 %v475_v31  ;;  %v468_v12 = vpack.c.bf16 %v360_v61, %v1621_v56  ;;  %v461_v16 = vpack.c.bf16 %v346_v63, %v345_v62  ;;  %v106_v17 = vadd.f32 %v105_v4, %v104_v57  ;;  %v99_v34 = vrot.slane %v98_v7, 2  ;;  %v329_v31 = vld [vmem:[%s1768_s2 + $0x440] sm:$0xff]  ;;  %v362_v14 = vld [vmem:[%s1768_s2 + $0x548] sm:$0xff]  ;;  %v331_v47 = vld [vmem:[%s1768_s2 + $0x450] sm:$0xff]  ;;  %s953_s20 = scalar_lea.vmem %s797_s19, 32  ;;  %p958_p1 = scmp.lt.s32.totalorder %s797_s19, %s797_s19 }
  0x4d   :  { %v59_v23 = vrot.slane %v58_v8, 1  ;;  %v95_v26 = vrot.slane %v94_v9, 1  ;;  %v71_v27 = vrot.slane %v70_v10, 1  ;;  %v52_v28 = vadd.f32 %v51_v5, %v50_v58  ;;  %v332_v48 = vld [vmem:[%s1768_s2 + $0x458] sm:$0xff]  ;;  %v363_v29 = vld [vmem:[%s1768_s2 + $0x550] sm:$0xff]  ;;  %v349_v56 = vld [vmem:[%s1768_s2 + $0x4e0] sm:$0xff]  ;;  %p954_p0 = scmp.ne.s32.totalorder %s797_s19, %s953_s20  ;;  %p959_p2 = scmp.lt.s32.totalorder %s953_s20, %s953_s20 }
  0x4e   :  { %901 = vmatpush3.bf16.msra.mxu0 %v451_v32  ;;  %v107_v37 = vrot.slane %v106_v17, 1  ;;  %v88_v38 = vadd.f32 %v87_v6, %v86_v59  ;;  %v64_v40 = vadd.f32 %v63_v11, %v62_v3  ;;  %v100_v41 = vadd.f32 %v99_v34, %v98_v7  ;;  %v364_v30 = vld [vmem:[%s1768_s2 + $0x558] sm:$0xff]  ;;  %v350_v57 = vld [vmem:[%s1768_s2 + $0x4e8] sm:$0xff]  ;;  %v381_v61 = vld [vmem:[%s1768_s2 + $0x5e0] sm:$0xff] }
  0x4f   :  { %923 = vmatpush3.bf16.msra.mxu1 %v467_v33  ;;  %902 = vmatprep.subr.bf16.mxu0 %v460_v35  ;;  %v60_v32 = vadd.f32 %v59_v23, %v58_v8  ;;  %v96_v42 = vadd.f32 %v95_v26, %v94_v9  ;;  %v72_v43 = vadd.f32 %v71_v27, %v70_v10  ;;  %v379_v35 = vld [vmem:[%s1768_s2 + $0x5d0] sm:$0xff]  ;;  %v53_v50 = vrot.slane %v52_v28, 1  ;;  %v382_v62 = vld [vmem:[%s1768_s2 + $0x5e8] sm:$0xff]  ;;  %v333_v4 = vld [vmem:[%s1768_s2 + $0x460] sm:$0xff]  ;;  %p960_p3 = por %p959_p2, %p958_p1 }
  0x50   :  { %924 = vmatprep.subr.bf16.mxu1 %v476_v39  ;;  %v477_v15 = vpack.c.bf16 %v378_v22, %v377_v21  ;;  %v108_v20 = vadd.f32 %v107_v37, %v106_v17  ;;  %v453_v33 = vpack.c.bf16 %v330_v36, %v329_v31  ;;  %v469_v45 = vpack.c.bf16 %v362_v14, %v361_v13  ;;  %v334_v5 = vld [vmem:[%s1768_s2 + $0x468] sm:$0xff]  ;;  %v365_v6 = vld [vmem:[%s1768_s2 + $0x560] sm:$0xff]  ;;  %v351_v11 = vld [vmem:[%s1768_s2 + $0x4f0] sm:$0xff] }
  0x51   :  { %v112_v25 = vmul.f32 0.125, %v60_v32  ;;  %v118_v39 = vmul.f32 0.125, %v96_v42  ;;  %v114_v44 = vmul.f32 0.125, %v72_v43  ;;  %v89_v51 = vrot.slane %v88_v38, 1  ;;  %v366_v10 = vld [vmem:[%s1768_s2 + $0x568] sm:$0xff]  ;;  %v384_v17 = vld [vmem:[%s1768_s2 + $0x5f8] sm:$0xff]  ;;  %p961_p4 = pnand %p960_p3, %p954_p0 }
  0x52   :  { %903 = vmatpush3.bf16.msra.mxu0 %v452_v46  ;;  %v120_v49 = vmul.f32 0.125, %v108_v20  ;;  %v462_v52 = vpack.c.bf16 %v348_v19, %v347_v18  ;;  %v65_v53 = vrot.slane %v64_v40, 1  ;;  %v101_v54 = vrot.slane %v100_v41, 1  ;;  %v335_v27 = vld [vmem:[%s1768_s2 + $0x470] sm:$0xff]  ;;  %v731_v18 = vld [vmem:[%s1770_s4 + $0x8] sm:$0x3] }
  0x53   :  { %925 = vmatpush3.bf16.msra.mxu1 %v468_v12  ;;  %904 = vmatprep.subr.bf16.mxu0 %v461_v16  ;;  %v172_v46 = vsel %vm168_vm0, %v118_v39, %v112_v25  ;;  %v478_v55 = vpack.c.bf16 %v380_v24, %v379_v35  ;;  %v454_v60 = vpack.c.bf16 %v332_v48, %v331_v47  ;;  %v352_v12 = vld [vmem:[%s1768_s2 + $0x4f8] sm:$0xff]  ;;  %v383_v16 = vld [vmem:[%s1768_s2 + $0x5f0] sm:$0xff]  ;;  %vm744_vm1 = vcmask 1044480   ;;  %v805_v25 = vld [vmem:[%s1769_s3] ss:$0 sm:$0xff] }
  0x54   :  { %926 = vmatprep.subr.bf16.mxu1 %v477_v15  ;;  %v190_v58 = vpack.c.bf16 %v172_v46, %v172_v46  ;;  %v174_v59 = vsel %vm168_vm0, %v120_v49, %v114_v44  ;;  %v470_v0 = vpack.c.bf16 %v364_v30, %v363_v29  ;;  %v54_v1 = vadd.f32 %v53_v50, %v52_v28  ;;  %v336_v28 = vld [vmem:[%s1768_s2 + $0x478] sm:$0xff]  ;;  %v730_v15 = vld [vmem:[%s1770_s4] sm:$0xff] }
  0x55   :  { %v192_v63 = vpack.c.bf16 %v174_v59, %v174_v59  ;;  %v90_v2 = vadd.f32 %v89_v51, %v88_v38  ;;  %v463_v3 = vpack.c.bf16 %v350_v57, %v349_v56  ;;  %v66_v7 = vadd.f32 %v65_v53, %v64_v40  ;;  %v367_v38 = vld [vmem:[%s1768_s2 + $0x570] sm:$0xff]  ;;  %v368_v40 = vld [vmem:[%s1768_s2 + $0x578] sm:$0xff] }
  0x56   :  { %905 = vmatpush3.bf16.msra.mxu0 %v453_v33  ;;  %680 = vmatprep.mubr.bf16.mxu0 %v190_v58  ;;  %v102_v8 = vadd.f32 %v101_v54, %v100_v41  ;;  %v479_v9 = vpack.c.bf16 %v382_v62, %v381_v61  ;;  %v455_v34 = vpack.c.bf16 %v334_v5, %v333_v4  ;;  %v111_v21 = vmul.f32 0.125, %v54_v1 }
  0x57   :  { %927 = vmatpush3.bf16.msra.mxu1 %v469_v45  ;;  %906 = vmatprep.subr.bf16.mxu0 %v462_v52  ;;  %v117_v22 = vmul.f32 0.125, %v90_v2  ;;  %v471_v23 = vpack.c.bf16 %v366_v10, %v365_v6  ;;  %v464_v26 = vpack.c.bf16 %v352_v12, %v351_v11  ;;  %v113_v31 = vmul.f32 0.125, %v66_v7 }
  0x58   :  { %928 = vmatprep.subr.bf16.mxu1 %v478_v55  ;;  %720 = vmatprep.mubr.bf16.mxu1 %v192_v63  ;;  %v119_v36 = vmul.f32 0.125, %v102_v8  ;;  %v480_v37 = vpack.c.bf16 %v384_v17, %v383_v16  ;;  %v456_v41 = vpack.c.bf16 %v336_v28, %v335_v27  ;;  %v472_v14 = vpack.c.bf16 %v368_v40, %v367_v38  ;;  %v806_v16 = vld [vmem:[%s1771_s5] ss:$0 sm:$0xff] }
  0x59   :  { %v171_v13 = vsel %vm168_vm0, %v117_v22, %v111_v21  ;;  %v732_v19 = vpack.c.bf16 %v731_v18, %v730_v15  ;;  %v978_v20 = vmov 0.0   ;;  %vm979_vm2 = vmmov 0  }
  0x5a   :  { %907 = vmatpush3.bf16.msra.mxu0 %v454_v60  ;;  %v173_v32 = vsel %vm168_vm0, %v119_v36, %v113_v31  ;;  %v189_v42 = vpack.c.bf16 %v171_v13, %v171_v13  ;;  %vm740_vm3 = vcmask 80896   ;;  %vm788_vm4 = vcmask 25600  }
  0x5b   :  { %929 = vmatpush3.bf16.msra.mxu1 %v470_v0  ;;  %908 = vmatprep.subr.bf16.mxu0 %v463_v3  ;;  %v191_v43 = vpack.c.bf16 %v173_v32, %v173_v32  ;;  %v746_v33 = vsel %vm744_vm1, %v732_v19, 0 }
  0x5c   :  { %930 = vmatprep.subr.bf16.mxu1 %v479_v9 }
  0x5e   :  { %909 = vmatpush3.bf16.msra.mxu0 %v455_v34 }
  0x5f   :  { %931 = vmatpush3.bf16.msra.mxu1 %v471_v23  ;;  %910 = vmatprep.subr.bf16.mxu0 %v464_v26 }
  0x60   :  { %932 = vmatprep.subr.bf16.mxu1 %v480_v37 }
  0x62   :  { %911 = vmatpush3.bf16.msra.mxu0 %v456_v41 }
  0x63   :  { %933 = vmatpush3.bf16.msra.mxu1 %v472_v14  ;;  %942 = vmatprep.subr.bf16.mxu0 %v978_v20 }
  0x65   :  { %681 = vmatmul.mubr.bf16.vlgmr.msra.gmra.mrb[8].mxu0 %v189_v42 }
  0x66   :  { %721 = vmatmul.mubr.bf16.vlgmr.msra.gmra.mrb[8].mxu1 %v191_v43  ;;  %943 = vmatpush3.bf16.msra.mxu0 %v746_v33 }
  0x67   :  { %944 = vmatprep.mubr.msk.bf16.mxu0 %vm979_vm2, %v978_v20 }
  0xf8   :  { %v824_v35 = vpop.f32.mrb[0].mxu0 }
  0xf9   :  { %v846_v24 = vpop.f32.mrb[0].mxu1  ;;  %v825_v39 = vpop.f32.mrb[1].mxu0 }
  0xfa   :  { %v826_v44 = vadd.f32 %v825_v39, %v824_v35  ;;  %v847_v45 = vpop.f32.mrb[1].mxu1  ;;  %v827_v47 = vpop.f32.mrb[2].mxu0 }
  0xfb   :  { %v848_v48 = vadd.f32 %v847_v45, %v846_v24  ;;  %v849_v49 = vpop.f32.mrb[2].mxu1  ;;  %v828_v50 = vpop.f32.mrb[3].mxu0 }
  0xfc   :  { %v523_v51 = vadd.f32 %v826_v44, %v805_v25  ;;  %v850_v52 = vpop.f32.mrb[3].mxu1 }
  0xfe   :  { %v563_v29 = vadd.f32 %v848_v48, %v523_v51 }
 0x118   :  { %v868_v30 = vpop.f32.mrb[4].mxu0 }
 0x119   :  { %v890_v46 = vpop.f32.mrb[4].mxu1  ;;  %v869_v53 = vpop.f32.mrb[5].mxu0 }
 0x11a   :  { %v870_v54 = vadd.f32 %v869_v53, %v868_v30  ;;  %v891_v55 = vpop.f32.mrb[5].mxu1  ;;  %v871_v56 = vpop.f32.mrb[6].mxu0 }
 0x11b   :  { %v892_v57 = vadd.f32 %v891_v55, %v890_v46  ;;  %v893_v58 = vpop.f32.mrb[6].mxu1  ;;  %v872_v59 = vpop.f32.mrb[7].mxu0 }
 0x11c   :  { %v603_v60 = vadd.f32 %v870_v54, %v563_v29  ;;  %v894_v61 = vpop.f32.mrb[7].mxu1 }
 0x11e   :  { %v643_v62 = vadd.f32 %v892_v57, %v603_v60 }
 0x138   :  { %v912_v63 = vpop.f32.mrb[8].mxu0 }
 0x139   :  { %v934_v0 = vpop.f32.mrb[8].mxu1  ;;  %v913_v1 = vpop.f32.mrb[9].mxu0 }
 0x13a   :  { %v914_v2 = vadd.f32 %v913_v1, %v912_v63  ;;  %v935_v3 = vpop.f32.mrb[9].mxu1  ;;  %v915_v4 = vpop.f32.mrb[10].mxu0 }
 0x13b   :  { %v936_v5 = vadd.f32 %v935_v3, %v934_v0  ;;  %v937_v6 = vpop.f32.mrb[10].mxu1  ;;  %v916_v7 = vpop.f32.mrb[11].mxu0 }
 0x13c   :  { %v683_v8 = vadd.f32 %v914_v2, %v643_v62  ;;  %v938_v9 = vpop.f32.mrb[11].mxu1 }
 0x13e   :  { %v723_v10 = vadd.f32 %v936_v5, %v683_v8 }
 0x140   :  { %v728_v11 = vmax.f32 %v723_v10, 0.0 }
 0x142   :  { %v729_v12 = vpack.c.bf16 %v728_v11, %v728_v11 }
 0x144   :  { %945 = vmatmul.mubr.msk.bf16.vlgmr.msra.gmra.mrb[12].mxu0 %vm740_vm3, %v729_v12 }
 0x217   :  { %v782_v17 = vpop.f32.mrb[12].mxu0 }
 0x218   :  { %v783_v34 = vadd.f32 %v806_v16, %v782_v17  ;;  %v946_v21 = vpop.f32.mrb[13].mxu0 }
 0x219   :  { %v785_v22 = vpop.f32.mrb[14].mxu0 }
 0x21a   :  { %v947_v23 = vpop.f32.mrb[15].mxu0  ;;  %789 = vst.msk [vmem:[#allocation2] sm:$0x3] %vm788_vm4, %v783_v34 }
 0x21b   :  { %964 = shalt.err (!%p961_p4)
}
 0x21c   :  { %s965_s5 = scalar_lea.hbm %s1772_s6, 32 }
 0x21d   :  { %p966_p5 = scmp.ne.s32.totalorder %s1772_s6, %s965_s5  ;;  %p969_p6 = scmp.lt.u32.totalorder %s965_s5, %s1772_s6 }
 0x21f   :  { %p971_p7 = pnand %p969_p6, %p966_p5 }
 0x221   :  { %974 = shalt.err (!%p971_p7)
}
 0x222   :  { %799 = dma.vmem_to_hbm [thread:$0]  %s797_s19, 32, %s1772_s6, [#allocation3]  }
 0x223   :  { %975 = dma.done.wait [#allocation3], 32  }
 0x224   :  { %976 = vsyncadd [#allocation3], 4294967264 }
 0x225   :  { %803 = vsyncpa [#allocation3], 1 }

</bundles_post_ra>
